<compile_context>
chip_gen: v7x
topology: tpu7x:2x2x1
jax: 0.10.0
libtpu: 0.0.40
codegen_flags: <defaults>
</compile_context>

<pallas_src>
import functools

import jax
import jax.numpy as jnp
from jax import lax
from jax.experimental import pallas as pl
from jax.experimental.pallas import tpu as pltpu

K_FEATURES = 3072
N_OUT = 2


def fc1_kernel(x_ref, w_ref, b_ref, o_ref):
    # x_ref: (TB, K)  f32 VMEM tile of the batch (streamed / double-buffered)
    # w_ref: (N, K)   f32 VMEM lane-dense weight (PyTorch layout, untransposed)
    # b_ref: (N,)     f32 SMEM scalars
    # o_ref: (TB, N)  f32 VMEM output tile
    #
    # MXU contraction: out[b, n] = sum_k x[b, k] * w[n, k].  Contracting dim 1
    # with dim 1 avoids any transpose; HIGHEST precision keeps full-f32
    # accuracy (still a trivial number of vmatmul pushes vs. the HBM stream).
    acc = jnp.einsum(
        "bk,nk->bn",
        x_ref[...],
        w_ref[...],
        precision=lax.Precision.HIGHEST,
        preferred_element_type=jnp.float32,
    )
    # Bias: two SMEM scalars -> (1, N) row via a lane-index select, so the
    # result is written back with a SINGLE store (no per-column vst.msk pair).
    col = lax.broadcasted_iota(jnp.int32, (1, N_OUT), 1)
    bias_row = jnp.where(col == 0, b_ref[0], b_ref[1])
    o_ref[...] = (acc + bias_row).astype(o_ref.dtype)


@functools.partial(jax.jit, static_argnames=("block_b",))
def fc1_forward(x, weight, bias, *, block_b=1024):
    """x: (B, 3072) f32; weight: (2, 3072) f32 (PyTorch layout); bias: (2,) f32."""
    B, K = x.shape
    N = weight.shape[0]

    # Row tile: multiple of 8 sublanes, capped at block_b = 1024 rows
    # (2 x 12 MiB double-buffered x stream; safe on v7x's 64 MiB VMEM).
    # If the whole batch fits in one tile but is larger than one sublane
    # group, split into ~2 grid steps so the "parallel" axis can be sharded
    # across v7x's two TensorCores.
    b8 = pl.cdiv(B, 8) * 8
    if b8 > block_b:
        tb = block_b
    elif b8 > 8:
        tb = pl.cdiv(b8 // 2, 8) * 8
    else:
        tb = 8
    b_pad = pl.cdiv(B, tb) * tb
    if b_pad != B:
        x = jnp.pad(x, ((0, b_pad - B), (0, 0)))

    out = pl.pallas_call(
        fc1_kernel,
        out_shape=jax.ShapeDtypeStruct((b_pad, N), x.dtype),
        grid=(b_pad // tb,),
        in_specs=[
            # x: (tb, 3072) tiles streamed from HBM, double-buffered by Pallas.
            pl.BlockSpec((tb, K), lambda i: (i, 0)),
            # Weight: lane-dense (2, 3072), same block every step (~96 KiB
            # padded).  TODO(synk): verify in the bundle dump that this
            # constant-index block is not re-DMA'd per step; if it is,
            # single-buffer it or hoist it to a once-loaded scratch.
            pl.BlockSpec((N, K), lambda i: (0, 0)),
            # Bias: two scalars in SMEM (no VMEM vreg / DMA descriptor waste).
            pl.BlockSpec(memory_space=pltpu.MemorySpace.SMEM),
        ],
        out_specs=pl.BlockSpec((tb, N), lambda i: (i, 0)),
        compiler_params=pltpu.CompilerParams(
            dimension_semantics=("parallel",),
            vmem_limit_bytes=32 * 1024 * 1024,
        ),
        cost_estimate=pl.CostEstimate(
            flops=2 * b_pad * K * N,
            transcendentals=0,
            bytes_accessed=4 * (b_pad * K + N * K + b_pad * N),
        ),
    )(x, weight, bias)
    return out[:B]


def init_fc1_params(key):
    """Deterministic init mimicking nn.Linear(3072, 2) default (uniform +/- 1/sqrt(fan_in))."""
    kw, kb = jax.random.split(key)
    bound = 1.0 / jnp.sqrt(K_FEATURES)
    weight = jax.random.uniform(kw, (N_OUT, K_FEATURES), jnp.float32, -bound, bound)
    bias = jax.random.uniform(kb, (N_OUT,), jnp.float32, -bound, bound)
    return weight, bias


if __name__ == "__main__":
    key = jax.random.PRNGKey(0)
    kx, kp = jax.random.split(key)

    B = 8                                   # small batch; features fixed at 3072 by the module
    x = jax.random.normal(kx, (B, K_FEATURES), jnp.float32)
    weight, bias = init_fc1_params(kp)

    out = jax.block_until_ready(fc1_forward(x, weight, bias))

    # Reference (same math as torch nn.Linear forward), full-precision matmul.
    ref = jnp.dot(x, weight.T, precision=lax.Precision.HIGHEST) + bias
    assert out.shape == (B, N_OUT), out.shape
    assert jnp.allclose(out, ref, atol=1e-4, rtol=1e-4), "mismatch vs reference"

    print("KERNEL_OK")
</pallas_src>

<mosaic_0001>
module attributes {stable_mosaic.version = 11 : i64} {
  func.func @fc1_kernel(%arg0: i32, %arg1: memref<8x3072xf32, #tpu.memory_space<vmem>>, %arg2: memref<2x3072xf32, #tpu.memory_space<vmem>>, %arg3: memref<2xf32, #tpu.memory_space<smem>>, %arg4: memref<8x2xf32, #tpu.memory_space<vmem>>) attributes {dimension_semantics = [#tpu.dimension_semantics<parallel>], iteration_bounds = array<i64: 1>, scalar_prefetch = 0 : i64, scratch_operands = 0 : i64, tpu.core_type = #tpu.core_type<tc>, window_params = [{transform_indices = @transform_0, window_bounds = array<i64: 8, 3072>}, {pipeline_mode = #tpu.pipeline_mode<synchronous>, transform_indices = @transform_1, window_bounds = array<i64: 2, 3072>}, {transform_indices = @transform_2, window_bounds = array<i64: 2>}, {transform_indices = @transform_3, window_bounds = array<i64: 8, 2>}]} {
    %c0 = arith.constant 0 : index
    %c0_0 = arith.constant 0 : index
    %0 = vector.load %arg1[%c0, %c0_0] : memref<8x3072xf32, #tpu.memory_space<vmem>>, vector<8x3072xf32>
    %c0_1 = arith.constant 0 : index
    %c0_2 = arith.constant 0 : index
    %1 = vector.load %arg2[%c0_1, %c0_2] : memref<2x3072xf32, #tpu.memory_space<vmem>>, vector<2x3072xf32>
    "tpu.trace_start"() <{level = 10 : i32, message = "bk,nk->bn"}> : () -> ()
    %cst = arith.constant dense<0.000000e+00> : vector<8x2xf32>
    %2 = tpu.matmul %0, %1, %cst {dimension_numbers = #tpu.dot_dimension_numbers<[1], [1], [0], [0], [0, 0, 1, 0], [], []>, precision = #tpu.contract_precision<fp32>} : vector<8x3072xf32>, vector<2x3072xf32>, vector<8x2xf32> -> vector<8x2xf32>
    "tpu.trace_stop"() : () -> ()
    %3 = tpu.iota {dimensions = array<i32: 1>} : vector<1x2xi32>
    %c0_i32 = arith.constant 0 : i32
    %4 = vector.broadcast %c0_i32 : i32 to vector<1x2xi32>
    %5 = arith.cmpi eq, %3, %4 : vector<1x2xi32>
    %c0_3 = arith.constant 0 : index
    %6 = memref.load %arg3[%c0_3] : memref<2xf32, #tpu.memory_space<smem>>
    %c1 = arith.constant 1 : index
    %7 = memref.load %arg3[%c1] : memref<2xf32, #tpu.memory_space<smem>>
    %8 = vector.broadcast %6 : f32 to vector<1x2xf32>
    %9 = vector.broadcast %7 : f32 to vector<1x2xf32>
    %10 = arith.select %5, %8, %9 : vector<1x2xi1>, vector<1x2xf32>
    %11 = vector.broadcast %10 : vector<1x2xf32> to vector<8x2xf32>
    %12 = arith.addf %2, %11 : vector<8x2xf32>
    %c0_4 = arith.constant 0 : index
    %c0_5 = arith.constant 0 : index
    %13 = vector.load %arg4[%c0_4, %c0_5] : memref<8x2xf32, #tpu.memory_space<vmem>>, vector<8x2xf32>
    tpu.vector_store %arg4[%c0_4, %c0_5], %12 {strides = array<i32>} : memref<8x2xf32, #tpu.memory_space<vmem>>, vector<8x2xf32>,
    return
  }
  func.func @transform_0(%arg0: i32) -> (i32, i32) {
    %c0_i32 = arith.constant 0 : i32
    %c0_i32_0 = arith.constant 0 : i32
    return %arg0, %c0_i32 : i32, i32
  }
  func.func @transform_1(%arg0: i32) -> (i32, i32) {
    %c0_i32 = arith.constant 0 : i32
    %c0_i32_0 = arith.constant 0 : i32
    %c0_i32_1 = arith.constant 0 : i32
    return %c0_i32, %c0_i32_0 : i32, i32
  }
  func.func @transform_2(%arg0: i32) -> i32 {
    %c0_i32 = arith.constant 0 : i32
    %c0_i32_0 = arith.constant 0 : i32
    return %c0_i32 : i32
  }
  func.func @transform_3(%arg0: i32) -> (i32, i32) {
    %c0_i32 = arith.constant 0 : i32
    %c0_i32_0 = arith.constant 0 : i32
    return %arg0, %c0_i32 : i32, i32
  }
}

</mosaic_0001>

<bundles_post_ra>
// kernel: fc1_forward.1
= control target key start
LH: loop header
LB: loop body
LE: loop exit
PB: predicated region body
PF: predicated region fallthrough
CT: control target
= control target key end

     0   :  { %8 = vsyncpa [#allocation3], 0  ;;  %s6803_s0 = inlined_call_operand.hbm [shape: f32[8,3072], index: 0, kind: input, shape index: {}]   ;;  %s6804_s1 = inlined_call_operand.hbm [shape: f32[2,3072], index: 1, kind: input, shape index: {}]   ;;  %s6805_s2 = inlined_call_operand.vmem [shape: f32[2], index: 2, kind: input, shape index: {}]   ;;  %s6806_s3 = inlined_call_operand.vmem [shape: f32[8,2], index: 3, kind: output, shape index: {}]  }
   0x1   :  { %9 = vsyncpa [#allocation6], 0 }
   0x2   :  { %10 = vsyncpa [#allocation4], 0  ;;  %s6109_s12 = smov [#allocation2]   ;;  %s6110_s14 = smov [#allocation5]  }
   0x3   :  { %s17_s13 = sshll.u32 %s6109_s12, 4  ;;  %s27_s15 = sshll.u32 %s6110_s14, 4  ;;  %s18_s13 = int_to_ptr.vmem [resolvable:$true] %s17_s13  ;;  %s28_s15 = int_to_ptr.vmem [resolvable:$true] %s27_s15 }
   0x4   :  { %s6047_s18 = scalar_lea.hbm %s6803_s0, 3072 }
   0x5   :  { %p6048_p0 = scmp.ne.s32.totalorder %s6803_s0, %s6047_s18  ;;  %p6051_p1 = scmp.lt.u32.totalorder %s6047_s18, %s6803_s0 }
   0x7   :  { %p6053_p2 = pnand %p6051_p1, %p6048_p0 }
   0x9   :  { %6056 = shalt.err (!%p6053_p2)
}
   0xa   :  { %s6057_s23 = scalar_lea.vmem %s18_s13, 3072  ;;  %p6062_p4 = scmp.lt.s32.totalorder %s18_s13, %s18_s13 }
   0xb   :  { %p6058_p3 = scmp.ne.s32.totalorder %s18_s13, %s6057_s23  ;;  %p6063_p5 = scmp.lt.s32.totalorder %s6057_s23, %s6057_s23 }
   0xd   :  { %p6064_p6 = por %p6063_p5, %p6062_p4 }
   0xf   :  { %p6065_p7 = pnand %p6064_p6, %p6058_p3 }
  0x11   :  { %6068 = shalt.err (!%p6065_p7)
}
  0x12   :  { %20 = dma.hbm_to_vmem [thread:$0]  %s6803_s0, 3072, %s18_s13, [#allocation3]  }
  0x13   :  { %s6069_s28 = scalar_lea.hbm %s6804_s1, 768 }
  0x14   :  { %p6070_p8 = scmp.ne.s32.totalorder %s6804_s1, %s6069_s28  ;;  %p6073_p9 = scmp.lt.u32.totalorder %s6069_s28, %s6804_s1 }
  0x16   :  { %p6075_p10 = pnand %p6073_p9, %p6070_p8 }
  0x18   :  { %6078 = shalt.err (!%p6075_p10)
}
  0x19   :  { %s6079_s6 = scalar_lea.vmem %s28_s15, 768  ;;  %p6084_p12 = scmp.lt.s32.totalorder %s28_s15, %s28_s15 }
  0x1a   :  { %p6080_p11 = scmp.ne.s32.totalorder %s28_s15, %s6079_s6  ;;  %p6085_p13 = scmp.lt.s32.totalorder %s6079_s6, %s6079_s6 }
  0x1c   :  { %p6086_p0 = por %p6085_p13, %p6084_p12 }
  0x1e   :  { %p6087_p1 = pnand %p6086_p0, %p6080_p11 }
  0x20   :  { %6090 = shalt.err (!%p6087_p1)
}
  0x21   :  { %30 = dma.hbm_to_vmem [thread:$0]  %s6804_s1, 768, %s28_s15, [#allocation6]  }
  0x22   :  { %s37_s10 = sshll.u32 %s6805_s2, 4  ;;  %s38_s10 = int_to_ptr.vmem [resolvable:$true] %s37_s10 }
  0x23   :  { %s6091_s11 = scalar_lea.vmem %s38_s10, 16  ;;  %p6096_p3 = scmp.lt.s32.totalorder %s38_s10, %s38_s10 }
  0x24   :  { %p6092_p2 = scmp.ne.s32.totalorder %s38_s10, %s6091_s11  ;;  %p6097_p4 = scmp.lt.s32.totalorder %s6091_s11, %s6091_s11 }
  0x26   :  { %p6098_p5 = por %p6097_p4, %p6096_p3 }
  0x28   :  { %p6099_p6 = pnand %p6098_p5, %p6092_p2 }
  0x2a   :  { %6102 = shalt.err (!%p6099_p6)
}
  0x2b   :  { %s6111_s12 = smov [#allocation7]  }
  0x2c   :  { %40 = dma.vmem_to_smem %s38_s10, 16, %s6111_s12, [#allocation4]  }
  0x2d   :  { %6103 = dma.done.wait [#allocation3], 3072  }
  0x2e   :  { %6104 = vsyncadd [#allocation3], 4294964224 }
  0x2f   :  { %6105 = dma.done.wait [#allocation6], 768  }
  0x30   :  { %6106 = vsyncadd [#allocation6], 4294966528 }
  0x31   :  { %6107 = dma.done.wait [#allocation4], 16  }
  0x32   :  { %6108 = vsyncadd [#allocation4], 4294967280 }
  0x33   :  { %50 = sfence }
  0x34   :  { %v81_v0 = vlaneseq  ;;  %v52_v1 = vld [vmem:[#allocation2 + $0x8] sm:$0xff]  ;;  %v6112_v2 = vmov 1983009808   ;;  %v51_v6 = vld [vmem:[#allocation2] sm:$0xff]  ;;  %v6174_v15 = vld [vmem:[#allocation5 + $0x18] sm:$0xff]  ;;  %s84_s1 = sld [smem:[#allocation7]] }
  0x35   :  { %v97_v3 = vunpack.c.l.s4 %v6112_v2  ;;  %v6160_v4 = vand.u32 4294901760, %v52_v1  ;;  %v64_v5 = vld [vmem:[#allocation2 + $0x68] sm:$0xff]  ;;  %v63_v7 = vld [vmem:[#allocation2 + $0x60] sm:$0xff]  ;;  %v6165_v10 = vand.u32 4294901760, %v51_v6  ;;  %v146_v57 = vcombine.high %v6174_v15, %v6174_v15  ;;  %v54_v62 = vld [vmem:[#allocation2 + $0x18] sm:$0xff]  ;;  %s5894_s2 = sld [smem:[#allocation7 + $0x1]] }
  0x36   :  { %v100_v8 = vshrl.u32 %v81_v0, 7  ;;  %v6163_v9 = vand.u32 4294901760, %v64_v5  ;;  %v6167_v11 = vand.u32 4294901760, %v63_v7  ;;  %v6172_v14 = vld [vmem:[#allocation5] sm:$0xff]  ;;  %v66_v63 = vld [vmem:[#allocation2 + $0x78] sm:$0xff]  ;;  %vm5885_vm1 = vcmask 15360  }
  0x37   :  { %v98_v12 = vunpack.c.0.s8 %v97_v3  ;;  %v6170_v13 = vsub.f32 %v52_v1, %v6160_v4  ;;  %v6180_v17 = vsub.f32 %v51_v6, %v6165_v10  ;;  %v95_v56 = vcombine.high %v6172_v14, %v6172_v14  ;;  %v53_v6 = vld [vmem:[#allocation2 + $0x10] sm:$0xff] }
  0x38   :  { %v6177_v16 = vsub.f32 %v64_v5, %v6163_v9  ;;  %v6183_v18 = vsub.f32 %v63_v7, %v6167_v11  ;;  %v6255_v1 = vand.u32 4294901760, %v54_v62  ;;  %v6257_v2 = vand.u32 4294901760, %v66_v63  ;;  %v65_v7 = vld [vmem:[#allocation2 + $0x70] sm:$0xff] }
  0x39   :  { %v6185_v19 = vsub.s32 %v98_v12, %v100_v8  ;;  %v289_v20 = vand.u32 4294901760, %v6170_v13  ;;  %v295_v22 = vand.u32 4294901760, %v6180_v17 }
  0x3a   :  { %v3121_v21 = vand.u32 4294901760, %v6177_v16  ;;  %v3127_v23 = vand.u32 4294901760, %v6183_v18  ;;  %v6270_v8 = vsub.f32 %v54_v62, %v6255_v1  ;;  %v6273_v12 = vsub.f32 %v66_v63, %v6257_v2 }
  0x3b   :  { %v102_v24 = vrot.slane %v6172_v14, %v6185_v19  ;;  %v153_v25 = vrot.slane %v6174_v15, %v6185_v19  ;;  %v290_v26 = vsub.f32 %v6170_v13, %v289_v20  ;;  %v296_v28 = vsub.f32 %v6180_v17, %v295_v22 }
  0x3c   :  { %v3122_v27 = vsub.f32 %v6177_v16, %v3121_v21  ;;  %v3128_v29 = vsub.f32 %v6183_v18, %v3127_v23  ;;  %v109_v58 = vrot.slane %v95_v56, %v6185_v19  ;;  %v160_v59 = vrot.slane %v146_v57, %v6185_v19  ;;  %v55_v56 = vld [vmem:[#allocation2 + $0x20] sm:$0xff] }
  0x3d   :  { %v110_v30 = vcombine.high %v102_v24, %v102_v24  ;;  %v161_v31 = vcombine.high %v153_v25, %v153_v25  ;;  %v6207_v32 = vand.u32 4294901760, %v102_v24  ;;  %v6209_v33 = vand.u32 4294901760, %v153_v25  ;;  %v67_v57 = vld [vmem:[#allocation2 + $0x80] sm:$0xff] }
  0x3e   :  { %v291_v34 = vand.u32 4294901760, %v290_v26  ;;  %v3123_v35 = vand.u32 4294901760, %v3122_v27  ;;  %v297_v40 = vand.u32 4294901760, %v296_v28  ;;  %v3129_v41 = vand.u32 4294901760, %v3128_v29 }
  0x3f   :  { %v6211_v36 = vand.u32 4294901760, %v110_v30  ;;  %v6213_v37 = vand.u32 4294901760, %v161_v31  ;;  %v6216_v38 = vsub.f32 %v102_v24, %v6207_v32  ;;  %v6219_v39 = vsub.f32 %v153_v25, %v6209_v33 }
  0x40   :  { %292 = vmatprep.mubr.f32.mxu1 %v291_v34  ;;  %3124 = vmatprep.mubr.f32.mxu0 %v3123_v35  ;;  %v111_v60 = vcombine.high %v109_v58, %v109_v58  ;;  %v162_v61 = vcombine.high %v160_v59, %v160_v59  ;;  %v6283_v15 = vand.u32 4294901760, %v53_v6  ;;  %v6395_v62 = vand.u32 4294901760, %v55_v56 }
  0x41   :  { %222 = vmatprep.subr.mxu1 %v6211_v36  ;;  %3054 = vmatprep.subr.mxu0 %v6213_v37  ;;  %v304_v42 = vsub.f32 %v110_v30, %v6211_v36  ;;  %v3136_v43 = vsub.f32 %v161_v31, %v6213_v37  ;;  %v311_v44 = vand.u32 4294901760, %v6216_v38  ;;  %v3143_v45 = vand.u32 4294901760, %v6219_v39 }
  0x42   :  { %224 = vmatpush1.xpose.msra.mxu1 %v6207_v32  ;;  %3056 = vmatpush1.xpose.msra.mxu0 %v6209_v33  ;;  %v6259_v3 = vand.u32 4294901760, %v111_v60  ;;  %v6261_v5 = vand.u32 4294901760, %v162_v61  ;;  %v6298_v24 = vsub.f32 %v53_v6, %v6283_v15  ;;  %v6397_v63 = vand.u32 4294901760, %v67_v57 }
  0x43   :  { %v305_v46 = vand.u32 4294901760, %v304_v42  ;;  %v3137_v47 = vand.u32 4294901760, %v3136_v43  ;;  %v312_v48 = vsub.f32 %v6216_v38, %v311_v44  ;;  %v3144_v49 = vsub.f32 %v6219_v39, %v3143_v45 }
  0x44   :  { %v6281_v14 = vsub.f32 %v162_v61, %v6261_v5 }
  0x45   :  { %298 = vmatmul.mubr.f32.vlgmr.msra.gmra.mrb[0].mxu1 %v297_v40  ;;  %3130 = vmatmul.mubr.f32.vlgmr.msra.gmra.mrb[0].mxu0 %v3129_v41  ;;  %v306_v50 = vsub.f32 %v304_v42, %v305_v46  ;;  %v3138_v51 = vsub.f32 %v3136_v43, %v3137_v47  ;;  %v313_v52 = vand.u32 4294901760, %v312_v48  ;;  %v3145_v53 = vand.u32 4294901760, %v3144_v49 }
  0x46   :  { %378 = vmatprep.mubr.f32.mxu1 %v6160_v4  ;;  %3210 = vmatprep.mubr.f32.mxu0 %v6163_v9 }
  0x47   :  { %v307_v54 = vand.u32 4294901760, %v306_v50  ;;  %v3139_v55 = vand.u32 4294901760, %v3138_v51  ;;  %v56_v50 = vld [vmem:[#allocation2 + $0x28] sm:$0xff] }
  0x48   :  { %v68_v51 = vld [vmem:[#allocation2 + $0x88] sm:$0xff] }
  0x49   :  { %308 = vmatprep.subr.mxu1 %v307_v54  ;;  %3140 = vmatprep.subr.mxu0 %v3139_v55 }
  0x4a   :  { %314 = vmatpush1.xpose.msra.mxu1 %v313_v52  ;;  %3146 = vmatpush1.xpose.msra.mxu0 %v3145_v53  ;;  %v6371_v52 = vand.u32 4294901760, %v56_v50  ;;  %v6373_v53 = vand.u32 4294901760, %v68_v51 }
  0x4b   :  { %387 = vmatprep.subr.mxu1 %v304_v42  ;;  %3219 = vmatprep.subr.mxu0 %v3136_v43 }
  0x4d   :  { %380 = vmatmul.mubr.f32.vlgmr.msra.gmra.mrb[0].mxu1 %v6165_v10  ;;  %3212 = vmatmul.mubr.f32.vlgmr.msra.gmra.mrb[0].mxu0 %v6167_v11 }
  0x4e   :  { %390 = vmatpush1.xpose.msra.mxu1 %v6216_v38  ;;  %3222 = vmatpush1.xpose.msra.mxu0 %v6219_v39 }
  0x4f   :  { %455 = vmatprep.mubr.f32.mxu1 %v6170_v13  ;;  %3287 = vmatprep.mubr.f32.mxu0 %v6177_v16  ;;  %v6278_v13 = vsub.f32 %v111_v60, %v6259_v3  ;;  %v6285_v16 = vand.u32 4294901760, %v65_v7 }
  0x50   :  { %464 = vmatprep.subr.mxu1 %v6211_v36  ;;  %3296 = vmatprep.subr.mxu0 %v6213_v37 }
  0x51   :  { %v6301_v25 = vsub.f32 %v65_v7, %v6285_v16 }
  0x53   :  { %v3599_v31 = vand.u32 4294901760, %v6301_v25 }
  0x55   :  { %458 = vmatmul.mubr.f32.vlgmr.msra.gmra.mrb[0].mxu1 %v6180_v17  ;;  %3290 = vmatmul.mubr.f32.vlgmr.msra.gmra.mrb[0].mxu0 %v6183_v18  ;;  %v6287_v17 = vand.u32 4294901760, %v109_v58  ;;  %v6289_v18 = vand.u32 4294901760, %v160_v59  ;;  %v3600_v39 = vsub.f32 %v6301_v25, %v3599_v31 }
  0x56   :  { %466 = vmatpush1.xpose.msra.mxu1 %v6207_v32  ;;  %3298 = vmatpush1.xpose.msra.mxu0 %v6209_v33 }
  0x57   :  { %532 = vmatprep.mubr.f32.mxu1 %v289_v20  ;;  %3364 = vmatprep.mubr.f32.mxu0 %v3121_v21  ;;  %v761_v20 = vand.u32 4294901760, %v6270_v8  ;;  %v3593_v21 = vand.u32 4294901760, %v6273_v12  ;;  %v6306_v26 = vsub.f32 %v109_v58, %v6287_v17  ;;  %v6309_v27 = vsub.f32 %v160_v59, %v6289_v18 }
  0x58   :  { %544 = vmatprep.subr.mxu1 %v305_v46  ;;  %3376 = vmatprep.subr.mxu0 %v3137_v47  ;;  %v6382_v58 = vsub.f32 %v56_v50, %v6371_v52  ;;  %v6385_v59 = vsub.f32 %v68_v51, %v6373_v53 }
  0x59   :  { %v762_v28 = vsub.f32 %v6270_v8, %v761_v20  ;;  %v3594_v29 = vsub.f32 %v6273_v12, %v3593_v21 }
  0x5b   :  { %v763_v34 = vand.u32 4294901760, %v762_v28  ;;  %v3595_v35 = vand.u32 4294901760, %v3594_v29 }
  0x5d   :  { %536 = vmatmul.mubr.f32.vlgmr.msra.gmra.mrb[0].mxu1 %v295_v22  ;;  %3368 = vmatmul.mubr.f32.vlgmr.msra.gmra.mrb[0].mxu0 %v3127_v23  ;;  %v777_v22 = vand.u32 4294901760, %v6278_v13  ;;  %v3609_v23 = vand.u32 4294901760, %v6281_v14 }
  0x5e   :  { %548 = vmatpush1.xpose.msra.mxu1 %v311_v44  ;;  %3380 = vmatpush1.xpose.msra.mxu0 %v3143_v45  ;;  %v6351_v44 = vld [vmem:[#allocation5 + $0x8] sm:$0xff]  ;;  %v6353_v45 = vld [vmem:[#allocation5 + $0x20] sm:$0xff] }
  0x5f   :  { %612 = vmatprep.mubr.f32.mxu1 %v6160_v4  ;;  %3444 = vmatprep.mubr.f32.mxu0 %v6163_v9  ;;  %v778_v30 = vsub.f32 %v6278_v13, %v777_v22  ;;  %v119_v46 = vrot.slane %v6351_v44, %v6185_v19  ;;  %v170_v47 = vrot.slane %v6353_v45, %v6185_v19 }
  0x60   :  { %620 = vmatprep.subr.mxu1 %v6211_v36  ;;  %3452 = vmatprep.subr.mxu0 %v6213_v37 }
  0x61   :  { %v779_v36 = vand.u32 4294901760, %v778_v30  ;;  %v127_v48 = vcombine.high %v119_v46, %v119_v46  ;;  %v178_v49 = vcombine.high %v170_v47, %v170_v47  ;;  %v6399_v6 = vand.u32 4294901760, %v119_v46 }
  0x62   :  { %v6401_v7 = vand.u32 4294901760, %v170_v47 }
  0x63   :  { %v6375_v54 = vand.u32 4294901760, %v127_v48  ;;  %v6377_v55 = vand.u32 4294901760, %v178_v49 }
  0x65   :  { %614 = vmatmul.mubr.f32.vlgmr.msra.gmra.mrb[0].mxu1 %v6165_v10  ;;  %3446 = vmatmul.mubr.f32.vlgmr.msra.gmra.mrb[0].mxu0 %v6167_v11  ;;  %v6390_v60 = vsub.f32 %v127_v48, %v6375_v54  ;;  %v6393_v61 = vsub.f32 %v178_v49, %v6377_v55 }
  0x66   :  { %622 = vmatpush1.xpose.msra.mxu1 %v6207_v32  ;;  %3454 = vmatpush1.xpose.msra.mxu0 %v6209_v33  ;;  %v783_v32 = vand.u32 4294901760, %v6306_v26  ;;  %v3615_v33 = vand.u32 4294901760, %v6309_v27 }
  0x67   :  { %686 = vmatprep.mubr.f32.mxu1 %v6160_v4  ;;  %3518 = vmatprep.mubr.f32.mxu0 %v6163_v9  ;;  %v3610_v4 = vsub.f32 %v6281_v14, %v3609_v23  ;;  %v767_v9 = vand.u32 4294901760, %v6298_v24 }
  0x68   :  { %694 = vmatprep.subr.mxu1 %v6259_v3  ;;  %3526 = vmatprep.subr.mxu0 %v6261_v5  ;;  %v784_v40 = vsub.f32 %v6306_v26, %v783_v32  ;;  %v3616_v41 = vsub.f32 %v6309_v27, %v3615_v33 }
  0x69   :  { %v3611_v37 = vand.u32 4294901760, %v3610_v4  ;;  %v768_v38 = vsub.f32 %v6298_v24, %v767_v9 }
  0x6a   :  { %v785_v43 = vand.u32 4294901760, %v784_v40  ;;  %v58_v40 = vld [vmem:[#allocation2 + $0x38] sm:$0xff] }
  0x6b   :  { %v769_v42 = vand.u32 4294901760, %v768_v38 }
  0x6d   :  { %688 = vmatmul.mubr.f32.vlgmr.msra.gmra.mrb[0].mxu1 %v6165_v10  ;;  %3520 = vmatmul.mubr.f32.vlgmr.msra.gmra.mrb[0].mxu0 %v6167_v11  ;;  %v3601_v10 = vand.u32 4294901760, %v3600_v39  ;;  %v3617_v11 = vand.u32 4294901760, %v3616_v41  ;;  %v70_v41 = vld [vmem:[#allocation2 + $0x98] sm:$0xff] }
  0x6e   :  { %696 = vmatpush1.xpose.msra.mxu1 %v6287_v17  ;;  %3528 = vmatpush1.xpose.msra.mxu0 %v6289_v18 }
  0x6f   :  { %764 = vmatprep.mubr.f32.mxu1 %v763_v34  ;;  %3596 = vmatprep.mubr.f32.mxu0 %v3595_v35  ;;  %v112_v34 = vcombine.high %v6351_v44, %v6351_v44  ;;  %v163_v35 = vcombine.high %v6353_v45, %v6353_v45  ;;  %v57_v44 = vld [vmem:[#allocation2 + $0x30] sm:$0xff] }
  0x70   :  { %780 = vmatprep.subr.mxu1 %v779_v36  ;;  %3612 = vmatprep.subr.mxu0 %v3611_v37  ;;  %v69_v45 = vld [vmem:[#allocation2 + $0x90] sm:$0xff]  ;;  %v6505_v50 = vand.u32 4294901760, %v57_v44 }
  0x71   :  { %v126_v36 = vrot.slane %v112_v34, %v6185_v19  ;;  %v177_v37 = vrot.slane %v163_v35, %v6185_v19  ;;  %v6507_v51 = vand.u32 4294901760, %v69_v45  ;;  %v59_v34 = vld [vmem:[#allocation2 + $0x40] sm:$0xff] }
  0x72   :  { %v71_v35 = vld [vmem:[#allocation2 + $0xa0] sm:$0xff] }
  0x73   :  { %v128_v38 = vcombine.high %v126_v36, %v126_v36  ;;  %v179_v39 = vcombine.high %v177_v37, %v177_v37 }
  0x75   :  { %770 = vmatmul.mubr.f32.vlgmr.msra.gmra.mrb[0].mxu1 %v769_v42  ;;  %3602 = vmatmul.mubr.f32.vlgmr.msra.gmra.mrb[0].mxu0 %v3601_v10  ;;  %v6481_v42 = vand.u32 4294901760, %v58_v40  ;;  %v6483_v10 = vand.u32 4294901760, %v70_v41 }
  0x76   :  { %786 = vmatpush1.xpose.msra.mxu1 %v785_v43  ;;  %3618 = vmatpush1.xpose.msra.mxu0 %v3617_v11  ;;  %v6485_v43 = vand.u32 4294901760, %v128_v38  ;;  %v6487_v11 = vand.u32 4294901760, %v179_v39 }
  0x77   :  { %850 = vmatprep.mubr.f32.mxu1 %v6255_v1  ;;  %3682 = vmatprep.mubr.f32.mxu0 %v6257_v2 }
  0x78   :  { %859 = vmatprep.subr.mxu1 %v6278_v13  ;;  %3691 = vmatprep.subr.mxu0 %v6281_v14  ;;  %v6410_v13 = vsub.f32 %v55_v56, %v6395_v62  ;;  %v6413_v14 = vsub.f32 %v67_v57, %v6397_v63  ;;  %v6500_v48 = vsub.f32 %v128_v38, %v6485_v43  ;;  %v6509_v56 = vand.u32 4294901760, %v126_v36 }
  0x79   :  { %v6503_v49 = vsub.f32 %v179_v39, %v6487_v11  ;;  %v6511_v57 = vand.u32 4294901760, %v177_v37 }
  0x7d   :  { %852 = vmatmul.mubr.f32.vlgmr.msra.gmra.mrb[0].mxu1 %v6283_v15  ;;  %3684 = vmatmul.mubr.f32.vlgmr.msra.gmra.mrb[0].mxu0 %v6285_v16 }
  0x7e   :  { %862 = vmatpush1.xpose.msra.mxu1 %v6306_v26  ;;  %3694 = vmatpush1.xpose.msra.mxu0 %v6309_v27 }
  0x7f   :  { %927 = vmatprep.mubr.f32.mxu1 %v6270_v8  ;;  %3759 = vmatprep.mubr.f32.mxu0 %v6273_v12  ;;  %v1233_v8 = vand.u32 4294901760, %v6382_v58  ;;  %v4081_v12 = vand.u32 4294901760, %v6393_v61 }
  0x80   :  { %936 = vmatprep.subr.mxu1 %v6259_v3  ;;  %3768 = vmatprep.subr.mxu0 %v6261_v5 }
  0x85   :  { %930 = vmatmul.mubr.f32.vlgmr.msra.gmra.mrb[0].mxu1 %v6298_v24  ;;  %3762 = vmatmul.mubr.f32.vlgmr.msra.gmra.mrb[0].mxu0 %v6301_v25 }
  0x86   :  { %938 = vmatpush1.xpose.msra.mxu1 %v6287_v17  ;;  %3770 = vmatpush1.xpose.msra.mxu0 %v6289_v18 }
  0x87   :  { %1004 = vmatprep.mubr.f32.mxu1 %v761_v20  ;;  %3836 = vmatprep.mubr.f32.mxu0 %v3593_v21  ;;  %v6418_v20 = vsub.f32 %v119_v46, %v6399_v6  ;;  %v6421_v21 = vsub.f32 %v170_v47, %v6401_v7  ;;  %v6492_v46 = vsub.f32 %v58_v40, %v6481_v42  ;;  %v6617_v40 = vand.u32 4294901760, %v59_v34 }
  0x88   :  { %1016 = vmatprep.subr.mxu1 %v777_v22  ;;  %3848 = vmatprep.subr.mxu0 %v3609_v23  ;;  %v1234_v22 = vsub.f32 %v6382_v58, %v1233_v8  ;;  %v4071_v23 = vand.u32 4294901760, %v6413_v14  ;;  %v6495_v47 = vsub.f32 %v70_v41, %v6483_v10  ;;  %v6619_v41 = vand.u32 4294901760, %v71_v35 }
  0x89   :  { %v1255_v24 = vand.u32 4294901760, %v6418_v20  ;;  %v4087_v25 = vand.u32 4294901760, %v6421_v21 }
  0x8a   :  { %v1235_v26 = vand.u32 4294901760, %v1234_v22  ;;  %v4072_v4 = vsub.f32 %v6413_v14, %v4071_v23 }
  0x8d   :  { %1008 = vmatmul.mubr.f32.vlgmr.msra.gmra.mrb[0].mxu1 %v767_v9  ;;  %3840 = vmatmul.mubr.f32.vlgmr.msra.gmra.mrb[0].mxu0 %v3599_v31  ;;  %v1256_v9 = vsub.f32 %v6418_v20, %v1255_v24  ;;  %v4088_v31 = vsub.f32 %v6421_v21, %v4087_v25 }
  0x8e   :  { %1020 = vmatpush1.xpose.msra.mxu1 %v783_v32  ;;  %3852 = vmatpush1.xpose.msra.mxu0 %v3615_v33 }
  0x8f   :  { %1084 = vmatprep.mubr.f32.mxu1 %v6255_v1  ;;  %3916 = vmatprep.mubr.f32.mxu0 %v6257_v2  ;;  %v1257_v33 = vand.u32 4294901760, %v1256_v9  ;;  %v60_v9 = vld [vmem:[#allocation2 + $0x48] sm:$0xff] }
  0x90   :  { %1092 = vmatprep.subr.mxu1 %v6259_v3  ;;  %3924 = vmatprep.subr.mxu0 %v6261_v5  ;;  %v4065_v3 = vand.u32 4294901760, %v6385_v59  ;;  %v1249_v5 = vand.u32 4294901760, %v6390_v60 }
  0x95   :  { %1086 = vmatmul.mubr.f32.vlgmr.msra.gmra.mrb[0].mxu1 %v6283_v15  ;;  %3918 = vmatmul.mubr.f32.vlgmr.msra.gmra.mrb[0].mxu0 %v6285_v16 }
  0x96   :  { %1094 = vmatpush1.xpose.msra.mxu1 %v6287_v17  ;;  %3926 = vmatpush1.xpose.msra.mxu0 %v6289_v18  ;;  %v4066_v17 = vsub.f32 %v6385_v59, %v4065_v3  ;;  %v1250_v18 = vsub.f32 %v6390_v60, %v1249_v5 }
  0x97   :  { %1158 = vmatprep.mubr.f32.mxu1 %v6255_v1  ;;  %3990 = vmatprep.mubr.f32.mxu0 %v6257_v2  ;;  %v4082_v1 = vsub.f32 %v6393_v61, %v4081_v12  ;;  %v1239_v2 = vand.u32 4294901760, %v6410_v13 }
  0x98   :  { %1166 = vmatprep.subr.mxu1 %v6375_v54  ;;  %3998 = vmatprep.subr.mxu0 %v6377_v55  ;;  %v4067_v27 = vand.u32 4294901760, %v4066_v17  ;;  %v1251_v28 = vand.u32 4294901760, %v1250_v18 }
  0x99   :  { %v4083_v29 = vand.u32 4294901760, %v4082_v1  ;;  %v1240_v30 = vsub.f32 %v6410_v13, %v1239_v2 }
  0x9b   :  { %v1241_v32 = vand.u32 4294901760, %v1240_v30 }
  0x9d   :  { %1160 = vmatmul.mubr.f32.vlgmr.msra.gmra.mrb[0].mxu1 %v6283_v15  ;;  %3992 = vmatmul.mubr.f32.vlgmr.msra.gmra.mrb[0].mxu0 %v6285_v16  ;;  %v4073_v15 = vand.u32 4294901760, %v4072_v4  ;;  %v4089_v16 = vand.u32 4294901760, %v4088_v31  ;;  %v72_v31 = vld [vmem:[#allocation2 + $0xa8] sm:$0xff] }
  0x9e   :  { %1168 = vmatpush1.xpose.msra.mxu1 %v6399_v6  ;;  %4000 = vmatpush1.xpose.msra.mxu0 %v6401_v7 }
  0x9f   :  { %1236 = vmatprep.mubr.f32.mxu1 %v1235_v26  ;;  %4068 = vmatprep.mubr.f32.mxu0 %v4067_v27  ;;  %v6573_v26 = vld [vmem:[#allocation5 + $0x10] sm:$0xff]  ;;  %v6575_v27 = vld [vmem:[#allocation5 + $0x28] sm:$0xff] }
  0xa0   :  { %1252 = vmatprep.subr.mxu1 %v1251_v28  ;;  %4084 = vmatprep.subr.mxu0 %v4083_v29  ;;  %v136_v28 = vrot.slane %v6573_v26, %v6185_v19  ;;  %v187_v29 = vrot.slane %v6575_v27, %v6185_v19 }
  0xa2   :  { %v144_v30 = vcombine.high %v136_v28, %v136_v28  ;;  %v195_v4 = vcombine.high %v187_v29, %v187_v29 }
  0xa5   :  { %1242 = vmatmul.mubr.f32.vlgmr.msra.gmra.mrb[0].mxu1 %v1241_v32  ;;  %4074 = vmatmul.mubr.f32.vlgmr.msra.gmra.mrb[0].mxu0 %v4073_v15  ;;  %v6593_v32 = vand.u32 4294901760, %v60_v9  ;;  %v6595_v15 = vand.u32 4294901760, %v72_v31 }
  0xa6   :  { %1258 = vmatpush1.xpose.msra.mxu1 %v1257_v33  ;;  %4090 = vmatpush1.xpose.msra.mxu0 %v4089_v16  ;;  %v6597_v33 = vand.u32 4294901760, %v144_v30  ;;  %v6599_v16 = vand.u32 4294901760, %v195_v4 }
  0xa7   :  { %1322 = vmatprep.mubr.f32.mxu1 %v6371_v52  ;;  %4154 = vmatprep.mubr.f32.mxu0 %v6373_v53 }
  0xa8   :  { %1331 = vmatprep.subr.mxu1 %v6390_v60  ;;  %4163 = vmatprep.subr.mxu0 %v6393_v61  ;;  %v6520_v60 = vsub.f32 %v57_v44, %v6505_v50  ;;  %v6523_v61 = vsub.f32 %v69_v45, %v6507_v51  ;;  %v6612_v38 = vsub.f32 %v144_v30, %v6597_v33  ;;  %v6621_v44 = vand.u32 4294901760, %v136_v28 }
  0xa9   :  { %v6615_v39 = vsub.f32 %v195_v4, %v6599_v16  ;;  %v6623_v45 = vand.u32 4294901760, %v187_v29 }
  0xad   :  { %1324 = vmatmul.mubr.f32.vlgmr.msra.gmra.mrb[0].mxu1 %v6395_v62  ;;  %4156 = vmatmul.mubr.f32.vlgmr.msra.gmra.mrb[0].mxu0 %v6397_v63 }
  0xae   :  { %1334 = vmatpush1.xpose.msra.mxu1 %v6418_v20  ;;  %4166 = vmatpush1.xpose.msra.mxu0 %v6421_v21 }
  0xaf   :  { %1399 = vmatprep.mubr.f32.mxu1 %v6382_v58  ;;  %4231 = vmatprep.mubr.f32.mxu0 %v6385_v59  ;;  %v1705_v58 = vand.u32 4294901760, %v6492_v46  ;;  %v4553_v59 = vand.u32 4294901760, %v6503_v49 }
  0xb0   :  { %1408 = vmatprep.subr.mxu1 %v6375_v54  ;;  %4240 = vmatprep.subr.mxu0 %v6377_v55 }
  0xb5   :  { %1402 = vmatmul.mubr.f32.vlgmr.msra.gmra.mrb[0].mxu1 %v6410_v13  ;;  %4234 = vmatmul.mubr.f32.vlgmr.msra.gmra.mrb[0].mxu0 %v6413_v14 }
  0xb6   :  { %1410 = vmatpush1.xpose.msra.mxu1 %v6399_v6  ;;  %4242 = vmatpush1.xpose.msra.mxu0 %v6401_v7 }
  0xb7   :  { %1476 = vmatprep.mubr.f32.mxu1 %v1233_v8  ;;  %4308 = vmatprep.mubr.f32.mxu0 %v4065_v3  ;;  %v6528_v8 = vsub.f32 %v126_v36, %v6509_v56  ;;  %v6531_v3 = vsub.f32 %v177_v37, %v6511_v57  ;;  %v6604_v36 = vsub.f32 %v60_v9, %v6593_v32 }
  0xb8   :  { %1488 = vmatprep.subr.mxu1 %v1249_v5  ;;  %4320 = vmatprep.subr.mxu0 %v4081_v12  ;;  %v1706_v5 = vsub.f32 %v6492_v46, %v1705_v58  ;;  %v4543_v12 = vand.u32 4294901760, %v6523_v61  ;;  %v6607_v37 = vsub.f32 %v72_v31, %v6595_v15 }
  0xb9   :  { %v1727_v13 = vand.u32 4294901760, %v6528_v8  ;;  %v4559_v14 = vand.u32 4294901760, %v6531_v3 }
  0xba   :  { %v1707_v20 = vand.u32 4294901760, %v1706_v5  ;;  %v4544_v1 = vsub.f32 %v6523_v61, %v4543_v12 }
  0xbd   :  { %1480 = vmatmul.mubr.f32.vlgmr.msra.gmra.mrb[0].mxu1 %v1239_v2  ;;  %4312 = vmatmul.mubr.f32.vlgmr.msra.gmra.mrb[0].mxu0 %v4071_v23  ;;  %v1728_v2 = vsub.f32 %v6528_v8, %v1727_v13  ;;  %v4560_v23 = vsub.f32 %v6531_v3, %v4559_v14 }
  0xbe   :  { %1492 = vmatpush1.xpose.msra.mxu1 %v1255_v24  ;;  %4324 = vmatpush1.xpose.msra.mxu0 %v4087_v25 }
  0xbf   :  { %1556 = vmatprep.mubr.f32.mxu1 %v6371_v52  ;;  %4388 = vmatprep.mubr.f32.mxu0 %v6373_v53  ;;  %v1729_v25 = vand.u32 4294901760, %v1728_v2  ;;  %v74_v2 = vld [vmem:[#allocation2 + $0xb8] sm:$0xff] }
  0xc0   :  { %1564 = vmatprep.subr.mxu1 %v6375_v54  ;;  %4396 = vmatprep.subr.mxu0 %v6377_v55  ;;  %v4537_v54 = vand.u32 4294901760, %v6495_v47  ;;  %v1721_v55 = vand.u32 4294901760, %v6500_v48 }
  0xc5   :  { %1558 = vmatmul.mubr.f32.vlgmr.msra.gmra.mrb[0].mxu1 %v6395_v62  ;;  %4390 = vmatmul.mubr.f32.vlgmr.msra.gmra.mrb[0].mxu0 %v6397_v63 }
  0xc6   :  { %1566 = vmatpush1.xpose.msra.mxu1 %v6399_v6  ;;  %4398 = vmatpush1.xpose.msra.mxu0 %v6401_v7  ;;  %v4538_v6 = vsub.f32 %v6495_v47, %v4537_v54  ;;  %v1722_v7 = vsub.f32 %v6500_v48, %v1721_v55 }
  0xc7   :  { %1630 = vmatprep.mubr.f32.mxu1 %v6371_v52  ;;  %4462 = vmatprep.mubr.f32.mxu0 %v6373_v53  ;;  %v4554_v52 = vsub.f32 %v6503_v49, %v4553_v59  ;;  %v1711_v53 = vand.u32 4294901760, %v6520_v60 }
  0xc8   :  { %1638 = vmatprep.subr.mxu1 %v6485_v43  ;;  %4470 = vmatprep.subr.mxu0 %v6487_v11  ;;  %v4539_v21 = vand.u32 4294901760, %v4538_v6  ;;  %v1723_v22 = vand.u32 4294901760, %v1722_v7 }
  0xc9   :  { %v4555_v17 = vand.u32 4294901760, %v4554_v52  ;;  %v1712_v18 = vsub.f32 %v6520_v60, %v1711_v53 }
  0xcb   :  { %v1713_v24 = vand.u32 4294901760, %v1712_v18 }
  0xcd   :  { %1632 = vmatmul.mubr.f32.vlgmr.msra.gmra.mrb[0].mxu1 %v6395_v62  ;;  %4464 = vmatmul.mubr.f32.vlgmr.msra.gmra.mrb[0].mxu0 %v6397_v63  ;;  %v4545_v62 = vand.u32 4294901760, %v4544_v1  ;;  %v4561_v63 = vand.u32 4294901760, %v4560_v23  ;;  %v62_v1 = vld [vmem:[#allocation2 + $0x58] sm:$0xff] }
  0xce   :  { %1640 = vmatpush1.xpose.msra.mxu1 %v6509_v56  ;;  %4472 = vmatpush1.xpose.msra.mxu0 %v6511_v57  ;;  %v6703_v23 = vand.u32 4294901760, %v62_v1 }
  0xcf   :  { %1708 = vmatprep.mubr.f32.mxu1 %v1707_v20  ;;  %4540 = vmatprep.mubr.f32.mxu0 %v4539_v21  ;;  %v129_v20 = vcombine.high %v6573_v26, %v6573_v26  ;;  %v180_v21 = vcombine.high %v6575_v27, %v6575_v27  ;;  %v73_v26 = vld [vmem:[#allocation2 + $0xb0] sm:$0xff] }
  0xd0   :  { %1724 = vmatprep.subr.mxu1 %v1723_v22  ;;  %4556 = vmatprep.subr.mxu0 %v4555_v17  ;;  %v6714_v27 = vsub.f32 %v62_v1, %v6703_v23  ;;  %v6729_v9 = vand.u32 4294901760, %v73_v26 }
  0xd1   :  { %v143_v22 = vrot.slane %v129_v20, %v6185_v19  ;;  %v194_v17 = vrot.slane %v180_v21, %v6185_v19 }
  0xd3   :  { %v145_v19 = vcombine.high %v143_v22, %v143_v22  ;;  %v196_v18 = vcombine.high %v194_v17, %v194_v17  ;;  %v6731_v31 = vand.u32 4294901760, %v143_v22 }
  0xd5   :  { %1714 = vmatmul.mubr.f32.vlgmr.msra.gmra.mrb[0].mxu1 %v1713_v24  ;;  %4546 = vmatmul.mubr.f32.vlgmr.msra.gmra.mrb[0].mxu0 %v4545_v62  ;;  %v6705_v24 = vand.u32 4294901760, %v74_v2  ;;  %v6707_v62 = vand.u32 4294901760, %v145_v19 }
  0xd6   :  { %1730 = vmatpush1.xpose.msra.mxu1 %v1729_v25  ;;  %4562 = vmatpush1.xpose.msra.mxu0 %v4561_v63  ;;  %v6709_v25 = vand.u32 4294901760, %v196_v18  ;;  %v61_v63 = vld [vmem:[#allocation2 + $0x50] sm:$0xff] }
  0xd7   :  { %1794 = vmatprep.mubr.f32.mxu1 %v6481_v42  ;;  %4626 = vmatprep.mubr.f32.mxu0 %v6483_v10  ;;  %v6727_v4 = vand.u32 4294901760, %v61_v63 }
  0xd8   :  { %1803 = vmatprep.subr.mxu1 %v6500_v48  ;;  %4635 = vmatprep.subr.mxu0 %v6503_v49  ;;  %v6632_v48 = vsub.f32 %v59_v34, %v6617_v40  ;;  %v6635_v49 = vsub.f32 %v71_v35, %v6619_v41  ;;  %v6725_v30 = vsub.f32 %v196_v18, %v6709_v25  ;;  %v6733_v34 = vand.u32 4294901760, %v194_v17 }
  0xd9   :  { %v2649_v35 = vand.u32 4294901760, %v6714_v27 }
  0xdd   :  { %1796 = vmatmul.mubr.f32.vlgmr.msra.gmra.mrb[0].mxu1 %v6505_v50  ;;  %4628 = vmatmul.mubr.f32.vlgmr.msra.gmra.mrb[0].mxu0 %v6507_v51 }
  0xde   :  { %1806 = vmatpush1.xpose.msra.mxu1 %v6528_v8  ;;  %4638 = vmatpush1.xpose.msra.mxu0 %v6531_v3 }
  0xdf   :  { %1871 = vmatprep.mubr.f32.mxu1 %v6492_v46  ;;  %4703 = vmatprep.mubr.f32.mxu0 %v6495_v47  ;;  %v2177_v46 = vand.u32 4294901760, %v6604_v36  ;;  %v5025_v47 = vand.u32 4294901760, %v6615_v39 }
  0xe0   :  { %1880 = vmatprep.subr.mxu1 %v6485_v43  ;;  %4712 = vmatprep.subr.mxu0 %v6487_v11 }
  0xe5   :  { %1874 = vmatmul.mubr.f32.vlgmr.msra.gmra.mrb[0].mxu1 %v6520_v60  ;;  %4706 = vmatmul.mubr.f32.vlgmr.msra.gmra.mrb[0].mxu0 %v6523_v61 }
  0xe6   :  { %1882 = vmatpush1.xpose.msra.mxu1 %v6509_v56  ;;  %4714 = vmatpush1.xpose.msra.mxu0 %v6511_v57 }
  0xe7   :  { %1948 = vmatprep.mubr.f32.mxu1 %v1705_v58  ;;  %4780 = vmatprep.mubr.f32.mxu0 %v4537_v54  ;;  %v6640_v58 = vsub.f32 %v136_v28, %v6621_v44  ;;  %v6643_v54 = vsub.f32 %v187_v29, %v6623_v45  ;;  %v6717_v28 = vsub.f32 %v74_v2, %v6705_v24 }
  0xe8   :  { %1960 = vmatprep.subr.mxu1 %v1721_v55  ;;  %4792 = vmatprep.subr.mxu0 %v4553_v59  ;;  %v2178_v55 = vsub.f32 %v6604_v36, %v2177_v46  ;;  %v5015_v59 = vand.u32 4294901760, %v6635_v49  ;;  %v6722_v29 = vsub.f32 %v145_v19, %v6707_v62 }
  0xe9   :  { %v2199_v60 = vand.u32 4294901760, %v6640_v58  ;;  %v5031_v61 = vand.u32 4294901760, %v6643_v54 }
  0xea   :  { %v2179_v8 = vand.u32 4294901760, %v2178_v55  ;;  %v5016_v52 = vsub.f32 %v6635_v49, %v5015_v59 }
  0xed   :  { %1952 = vmatmul.mubr.f32.vlgmr.msra.gmra.mrb[0].mxu1 %v1711_v53  ;;  %4784 = vmatmul.mubr.f32.vlgmr.msra.gmra.mrb[0].mxu0 %v4543_v12  ;;  %v2200_v53 = vsub.f32 %v6640_v58, %v2199_v60  ;;  %v5032_v12 = vsub.f32 %v6643_v54, %v5031_v61 }
  0xee   :  { %1964 = vmatpush1.xpose.msra.mxu1 %v1727_v13  ;;  %4796 = vmatpush1.xpose.msra.mxu0 %v4559_v14 }
  0xef   :  { %2028 = vmatprep.mubr.f32.mxu1 %v6481_v42  ;;  %4860 = vmatprep.mubr.f32.mxu0 %v6483_v10  ;;  %v2201_v14 = vand.u32 4294901760, %v2200_v53 }
  0xf0   :  { %2036 = vmatprep.subr.mxu1 %v6485_v43  ;;  %4868 = vmatprep.subr.mxu0 %v6487_v11  ;;  %v5009_v43 = vand.u32 4294901760, %v6607_v37  ;;  %v2193_v11 = vand.u32 4294901760, %v6612_v38 }
  0xf5   :  { %2030 = vmatmul.mubr.f32.vlgmr.msra.gmra.mrb[0].mxu1 %v6505_v50  ;;  %4862 = vmatmul.mubr.f32.vlgmr.msra.gmra.mrb[0].mxu0 %v6507_v51 }
  0xf6   :  { %2038 = vmatpush1.xpose.msra.mxu1 %v6509_v56  ;;  %4870 = vmatpush1.xpose.msra.mxu0 %v6511_v57  ;;  %v5010_v56 = vsub.f32 %v6607_v37, %v5009_v43  ;;  %v2194_v57 = vsub.f32 %v6612_v38, %v2193_v11 }
  0xf7   :  { %2102 = vmatprep.mubr.f32.mxu1 %v6481_v42  ;;  %4934 = vmatprep.mubr.f32.mxu0 %v6483_v10  ;;  %v5026_v42 = vsub.f32 %v6615_v39, %v5025_v47  ;;  %v2183_v10 = vand.u32 4294901760, %v6632_v48 }
  0xf8   :  { %2110 = vmatprep.subr.mxu1 %v6597_v33  ;;  %4942 = vmatprep.subr.mxu0 %v6599_v16  ;;  %v5011_v3 = vand.u32 4294901760, %v5010_v56  ;;  %v2195_v5 = vand.u32 4294901760, %v2194_v57 }
  0xf9   :  { %v5027_v6 = vand.u32 4294901760, %v5026_v42  ;;  %v2184_v7 = vsub.f32 %v6632_v48, %v2183_v10 }
  0xfb   :  { %v2185_v13 = vand.u32 4294901760, %v2184_v7 }
  0xfd   :  { %2104 = vmatmul.mubr.f32.vlgmr.msra.gmra.mrb[0].mxu1 %v6505_v50  ;;  %4936 = vmatmul.mubr.f32.vlgmr.msra.gmra.mrb[0].mxu0 %v6507_v51  ;;  %v5017_v50 = vand.u32 4294901760, %v5016_v52  ;;  %v5033_v51 = vand.u32 4294901760, %v5032_v12 }
  0xfe   :  { %2112 = vmatpush1.xpose.msra.mxu1 %v6621_v44  ;;  %4944 = vmatpush1.xpose.msra.mxu0 %v6623_v45 }
  0xff   :  { %2180 = vmatprep.mubr.f32.mxu1 %v2179_v8  ;;  %5012 = vmatprep.mubr.f32.mxu0 %v5011_v3  ;;  %v87_v3 = vstv %s5894_s2 }
 0x100   :  { %2196 = vmatprep.subr.mxu1 %v2195_v5  ;;  %5028 = vmatprep.subr.mxu0 %v5027_v6 }
 0x105   :  { %2186 = vmatmul.mubr.f32.vlgmr.msra.gmra.mrb[0].mxu1 %v2185_v13  ;;  %5018 = vmatmul.mubr.f32.vlgmr.msra.gmra.mrb[0].mxu0 %v5017_v50 }
 0x106   :  { %2202 = vmatpush1.xpose.msra.mxu1 %v2201_v14  ;;  %5034 = vmatpush1.xpose.msra.mxu0 %v5033_v51 }
 0x107   :  { %2266 = vmatprep.mubr.f32.mxu1 %v6593_v32  ;;  %5098 = vmatprep.mubr.f32.mxu0 %v6595_v15 }
 0x108   :  { %2275 = vmatprep.subr.mxu1 %v6612_v38  ;;  %5107 = vmatprep.subr.mxu0 %v6615_v39  ;;  %v5486_v38 = vsub.f32 %v73_v26, %v6729_v9  ;;  %v2670_v39 = vsub.f32 %v143_v22, %v6731_v31 }
 0x10d   :  { %2268 = vmatmul.mubr.f32.vlgmr.msra.gmra.mrb[0].mxu1 %v6617_v40  ;;  %5100 = vmatmul.mubr.f32.vlgmr.msra.gmra.mrb[0].mxu0 %v6619_v41 }
 0x10e   :  { %2278 = vmatpush1.xpose.msra.mxu1 %v6640_v58  ;;  %5110 = vmatpush1.xpose.msra.mxu0 %v6643_v54 }
 0x10f   :  { %2343 = vmatprep.mubr.f32.mxu1 %v6604_v36  ;;  %5175 = vmatprep.mubr.f32.mxu0 %v6607_v37  ;;  %v5497_v36 = vand.u32 4294901760, %v6725_v30  ;;  %v2654_v37 = vsub.f32 %v61_v63, %v6727_v4 }
 0x110   :  { %2352 = vmatprep.subr.mxu1 %v6597_v33  ;;  %5184 = vmatprep.subr.mxu0 %v6599_v16 }
 0x115   :  { %2346 = vmatmul.mubr.f32.vlgmr.msra.gmra.mrb[0].mxu1 %v6632_v48  ;;  %5178 = vmatmul.mubr.f32.vlgmr.msra.gmra.mrb[0].mxu0 %v6635_v49 }
 0x116   :  { %2354 = vmatpush1.xpose.msra.mxu1 %v6621_v44  ;;  %5186 = vmatpush1.xpose.msra.mxu0 %v6623_v45 }
 0x117   :  { %2420 = vmatprep.mubr.f32.mxu1 %v2177_v46  ;;  %5252 = vmatprep.mubr.f32.mxu0 %v5009_v43  ;;  %v5502_v46 = vsub.f32 %v194_v17, %v6733_v34  ;;  %v2650_v43 = vsub.f32 %v6714_v27, %v2649_v35 }
 0x118   :  { %2432 = vmatprep.subr.mxu1 %v2193_v11  ;;  %5264 = vmatprep.subr.mxu0 %v5025_v47  ;;  %v2671_v47 = vand.u32 4294901760, %v2670_v39 }
 0x119   :  { %v5503_v48 = vand.u32 4294901760, %v5502_v46  ;;  %v2651_v49 = vand.u32 4294901760, %v2650_v43 }
 0x11a   :  { %v2672_v42 = vsub.f32 %v2670_v39, %v2671_v47 }
 0x11d   :  { %2424 = vmatmul.mubr.f32.vlgmr.msra.gmra.mrb[0].mxu1 %v2183_v10  ;;  %5256 = vmatmul.mubr.f32.vlgmr.msra.gmra.mrb[0].mxu0 %v5015_v59  ;;  %v5504_v10 = vsub.f32 %v5502_v46, %v5503_v48 }
 0x11e   :  { %2436 = vmatpush1.xpose.msra.mxu1 %v2199_v60  ;;  %5268 = vmatpush1.xpose.msra.mxu0 %v5031_v61  ;;  %v2673_v61 = vand.u32 4294901760, %v2672_v42 }
 0x11f   :  { %2500 = vmatprep.mubr.f32.mxu1 %v6593_v32  ;;  %5332 = vmatprep.mubr.f32.mxu0 %v6595_v15  ;;  %v5505_v8 = vand.u32 4294901760, %v5504_v10 }
 0x120   :  { %2508 = vmatprep.subr.mxu1 %v6597_v33  ;;  %5340 = vmatprep.subr.mxu0 %v6599_v16  ;;  %v5481_v33 = vand.u32 4294901760, %v6717_v28  ;;  %v2665_v16 = vand.u32 4294901760, %v6722_v29 }
 0x122   :  { %v5482_v11 = vsub.f32 %v6717_v28, %v5481_v33 }
 0x124   :  { %v5483_v58 = vand.u32 4294901760, %v5482_v11 }
 0x125   :  { %2502 = vmatmul.mubr.f32.vlgmr.msra.gmra.mrb[0].mxu1 %v6617_v40  ;;  %5334 = vmatmul.mubr.f32.vlgmr.msra.gmra.mrb[0].mxu0 %v6619_v41 }
 0x126   :  { %2510 = vmatpush1.xpose.msra.mxu1 %v6621_v44  ;;  %5342 = vmatpush1.xpose.msra.mxu0 %v6623_v45  ;;  %v2666_v44 = vsub.f32 %v6722_v29, %v2665_v16  ;;  %v5487_v45 = vand.u32 4294901760, %v5486_v38 }
 0x127   :  { %2574 = vmatprep.mubr.f32.mxu1 %v6593_v32  ;;  %5406 = vmatprep.mubr.f32.mxu0 %v6595_v15  ;;  %v5498_v32 = vsub.f32 %v6725_v30, %v5497_v36  ;;  %v2655_v15 = vand.u32 4294901760, %v2654_v37 }
 0x128   :  { %2582 = vmatprep.subr.mxu1 %v6707_v62  ;;  %5414 = vmatprep.subr.mxu0 %v6709_v25  ;;  %v2667_v54 = vand.u32 4294901760, %v2666_v44  ;;  %v5488_v57 = vsub.f32 %v5486_v38, %v5487_v45 }
 0x129   :  { %v5499_v55 = vand.u32 4294901760, %v5498_v32  ;;  %v2656_v56 = vsub.f32 %v2654_v37, %v2655_v15 }
 0x12a   :  { %v5489_v60 = vand.u32 4294901760, %v5488_v57 }
 0x12b   :  { %v2657_v59 = vand.u32 4294901760, %v2656_v56 }
 0x12d   :  { %2576 = vmatmul.mubr.f32.vlgmr.msra.gmra.mrb[0].mxu1 %v6617_v40  ;;  %5408 = vmatmul.mubr.f32.vlgmr.msra.gmra.mrb[0].mxu0 %v6619_v41  ;;  %v82_v40 = vand.u32 127, %v81_v0  ;;  %v86_v41 = vstv %s84_s1 }
 0x12e   :  { %2584 = vmatpush1.xpose.msra.mxu1 %v6731_v31  ;;  %5416 = vmatpush1.xpose.msra.mxu0 %v6733_v34 }
 0x12f   :  { %2652 = vmatprep.mubr.f32.mxu1 %v2651_v49  ;;  %5484 = vmatprep.mubr.f32.mxu0 %v5483_v58  ;;  %vm83_vm0 = vcmp.eq.s32.totalorder %v82_v40, 0 }
 0x130   :  { %2668 = vmatprep.subr.mxu1 %v2667_v54  ;;  %5500 = vmatprep.subr.mxu0 %v5499_v55  ;;  %v88_v5 = vsel %vm83_vm0, %v86_v41, %v87_v3 }
 0x135   :  { %2658 = vmatmul.mubr.f32.vlgmr.msra.gmra.mrb[0].mxu1 %v2657_v59  ;;  %5490 = vmatmul.mubr.f32.vlgmr.msra.gmra.mrb[0].mxu0 %v5489_v60 }
 0x136   :  { %2674 = vmatpush1.xpose.msra.mxu1 %v2673_v61  ;;  %5506 = vmatpush1.xpose.msra.mxu0 %v5505_v8 }
 0x137   :  { %2738 = vmatprep.mubr.f32.mxu1 %v6703_v23  ;;  %5570 = vmatprep.mubr.f32.mxu0 %v6705_v24 }
 0x138   :  { %2747 = vmatprep.subr.mxu1 %v6722_v29  ;;  %5579 = vmatprep.subr.mxu0 %v6725_v30 }
 0x13d   :  { %2740 = vmatmul.mubr.f32.vlgmr.msra.gmra.mrb[0].mxu1 %v6727_v4  ;;  %5572 = vmatmul.mubr.f32.vlgmr.msra.gmra.mrb[0].mxu0 %v6729_v9 }
 0x13e   :  { %2750 = vmatpush1.xpose.msra.mxu1 %v2670_v39  ;;  %5582 = vmatpush1.xpose.msra.mxu0 %v5502_v46 }
 0x13f   :  { %2815 = vmatprep.mubr.f32.mxu1 %v6714_v27  ;;  %5647 = vmatprep.mubr.f32.mxu0 %v6717_v28 }
 0x140   :  { %2824 = vmatprep.subr.mxu1 %v6707_v62  ;;  %5656 = vmatprep.subr.mxu0 %v6709_v25 }
 0x145   :  { %2818 = vmatmul.mubr.f32.vlgmr.msra.gmra.mrb[0].mxu1 %v2654_v37  ;;  %5650 = vmatmul.mubr.f32.vlgmr.msra.gmra.mrb[0].mxu0 %v5486_v38 }
 0x146   :  { %2826 = vmatpush1.xpose.msra.mxu1 %v6731_v31  ;;  %5658 = vmatpush1.xpose.msra.mxu0 %v6733_v34 }
 0x147   :  { %2892 = vmatprep.mubr.f32.mxu1 %v2649_v35  ;;  %5724 = vmatprep.mubr.f32.mxu0 %v5481_v33 }
 0x148   :  { %2904 = vmatprep.subr.mxu1 %v2665_v16  ;;  %5736 = vmatprep.subr.mxu0 %v5497_v36 }
 0x14d   :  { %2896 = vmatmul.mubr.f32.vlgmr.msra.gmra.mrb[0].mxu1 %v2655_v15  ;;  %5728 = vmatmul.mubr.f32.vlgmr.msra.gmra.mrb[0].mxu0 %v5487_v45 }
 0x14e   :  { %2908 = vmatpush1.xpose.msra.mxu1 %v2671_v47  ;;  %5740 = vmatpush1.xpose.msra.mxu0 %v5503_v48 }
 0x14f   :  { %2972 = vmatprep.mubr.f32.mxu1 %v6703_v23  ;;  %5804 = vmatprep.mubr.f32.mxu0 %v6705_v24 }
 0x150   :  { %2980 = vmatprep.subr.mxu1 %v6707_v62  ;;  %5812 = vmatprep.subr.mxu0 %v6709_v25 }
 0x155   :  { %2974 = vmatmul.mubr.f32.vlgmr.msra.gmra.mrb[0].mxu1 %v6727_v4  ;;  %5806 = vmatmul.mubr.f32.vlgmr.msra.gmra.mrb[0].mxu0 %v6729_v9 }
 0x156   :  { %2982 = vmatpush1.xpose.msra.mxu1 %v6731_v31  ;;  %5814 = vmatpush1.xpose.msra.mxu0 %v6733_v34 }
 0x157   :  { %3046 = vmatprep.mubr.f32.mxu1 %v6703_v23  ;;  %5878 = vmatprep.mubr.f32.mxu0 %v6705_v24 }
 0x15d   :  { %3048 = vmatmul.mubr.f32.vlgmr.msra.gmra.mrb[0].mxu1 %v6727_v4  ;;  %5880 = vmatmul.mubr.f32.vlgmr.msra.gmra.mrb[0].mxu0 %v6729_v9 }
 0x230   :  { %v3049_v6 = vpop.f32.mrb[0].mxu1  ;;  %v5881_v7 = vpop.f32.mrb[0].mxu0 }
 0x231   :  { %v5895_v52 = vadd.f32 %v3049_v6, %v88_v5  ;;  %v3051_v53 = vpop.f32.mrb[1].mxu1  ;;  %v5883_v12 = vpop.f32.mrb[1].mxu0 }
 0x233   :  { %v5896_v13 = vadd.f32 %v5895_v52, %v5881_v7 }
 0x235   :  { %5886 = vst.msk [vmem:[%s6806_s3] sm:$0xff] %vm5885_vm1, %v5896_v13 }
 0x236   :  { %5891 = vsyncpa [#allocation3], 1 }
 0x237   :  { %5892 = vsyncpa [#allocation6], 1 }
 0x238   :  { %5893 = vsyncpa [#allocation4], 1 }

</bundles_post_ra>
